<compile_context>
chip_gen: v5e
topology: v5e:2x2
jax: 0.10.0
libtpu: 0.0.40
codegen_flags: <defaults>
</compile_context>

<pallas_src>
import functools

import jax
import jax.numpy as jnp
from jax import lax
from jax.experimental import pallas as pl
from jax.experimental.pallas import tpu as pltpu

LANE = 128
SUBLANE = 8


def _round_up(n, m):
    return ((n + m - 1) // m) * m


def mlp_kernel(x_ref, w1_ref, b1_ref, w2_ref, b2_ref, o_ref):
    cdt = w1_ref.dtype
    # Cast the streamed f32 activations to the compute dtype on the VPU
    # (avoids a separate HBM pad/cast pass over x in the wrapper).
    x = x_ref[...].astype(cdt)
    # fc1: (TB, D) @ (H, D)^T -> (TB, H), f32 accumulation on the MXU.
    h = lax.dot_general(
        x, w1_ref[...],
        dimension_numbers=(((1,), (1,)), ((), ())),
        preferred_element_type=jnp.float32,
    )
    # Bias + ReLU in f32 on the VPU (b1/b2 are grid-invariant, VMEM-resident).
    h = jnp.maximum(h + b1_ref[...], 0.0)
    # fc2: (TB, H) @ (C, H)^T -> (TB, C), f32 accumulation.
    out = lax.dot_general(
        h.astype(cdt), w2_ref[...],
        dimension_numbers=(((1,), (1,)), ((), ())),
        preferred_element_type=jnp.float32,
    )
    o_ref[...] = (out + b2_ref[...]).astype(o_ref.dtype)


def prepare_params(w1, b1, w2, b2, compute_dtype=jnp.bfloat16):
    """Cast PyTorch-layout Linear params once (outside the per-call hot path).

    No padding is needed: BlockSpec dims that are not multiples of (8, 128) are
    passed as the full array dim and Mosaic tiles/pads them inside VMEM.
    """
    return (
        w1.astype(compute_dtype),               # (H, D)
        b1.astype(jnp.float32).reshape(1, -1),  # (1, H)
        w2.astype(compute_dtype),               # (C, H)
        b2.astype(jnp.float32).reshape(1, -1),  # (1, C)
    )


def _vmem_estimate(tb, d, h, c, compute_itemsize):
    """Rough VMEM footprint (lane/sublane-padded, double-buffered), in bytes."""
    def tile(rows, cols, itemsize):
        sub = SUBLANE if itemsize >= 4 else SUBLANE * (4 // itemsize)
        return _round_up(max(rows, 1), sub) * _round_up(max(cols, 1), LANE) * itemsize

    est = 2 * tile(tb, d, 4)                       # x tiles (double-buffered, f32)
    est += 2 * tile(tb, c, 4)                      # out tiles (double-buffered, f32)
    est += 2 * tile(h, d, compute_itemsize)        # w1
    est += 2 * tile(c, h, compute_itemsize)        # w2
    est += 2 * tile(1, h, 4) + 2 * tile(1, c, 4)   # biases
    est += tile(tb, d, compute_itemsize)           # in-kernel casted x
    est += 2 * tile(tb, h, 4)                      # h (f32) + casted copy
    return est


@functools.partial(jax.jit, static_argnums=(2,))
def mnist_forward(x, params, batch_tile=512):
    """x: (B, input_size) f32. Returns (B, num_classes) f32 logits."""
    w1, b1, w2, b2 = params
    H, D = w1.shape
    C, _ = w2.shape
    B = x.shape[0]

    if B <= batch_tile:
        # Single tile == full array: no batch padding at all; any B is legal.
        tb, b_pad = B, B
    else:
        tb = _round_up(batch_tile, SUBLANE)
        b_pad = _round_up(B, tb)
    grid = (b_pad // tb,)

    # Only pad batch rows when B is not already a whole number of tiles.
    x_in = x if b_pad == B else jnp.zeros((b_pad, D), x.dtype).at[:B].set(x)

    vmem_limit = int(min(
        64 * 2**20,
        max(32 * 2**20, 2 * _vmem_estimate(tb, D, H, C, w1.dtype.itemsize)),
    ))

    out = pl.pallas_call(
        mlp_kernel,
        out_shape=jax.ShapeDtypeStruct((b_pad, C), jnp.float32),
        grid_spec=pltpu.PrefetchScalarGridSpec(
            num_scalar_prefetch=0,
            grid=grid,
            in_specs=[
                pl.BlockSpec((tb, D), lambda i: (i, 0)),   # x tile (pipelined)
                pl.BlockSpec((H, D), lambda i: (0, 0)),    # w1 (VMEM-resident)
                pl.BlockSpec((1, H), lambda i: (0, 0)),    # b1 (VMEM-resident)
                pl.BlockSpec((C, H), lambda i: (0, 0)),    # w2 (VMEM-resident)
                pl.BlockSpec((1, C), lambda i: (0, 0)),    # b2 (VMEM-resident)
            ],
            out_specs=pl.BlockSpec((tb, C), lambda i: (i, 0)),  # C unpadded
        ),
        compiler_params=pltpu.CompilerParams(
            dimension_semantics=("parallel",),   # megacore split over batch tiles
            vmem_limit_bytes=vmem_limit,
        ),
    )(x_in, w1, b1, w2, b2)

    # Batch slice only when rows were actually padded; no class slice needed.
    return out if b_pad == B else out[:B]


def init_linear_params(key, in_features, out_features, dtype=jnp.float32):
    """PyTorch nn.Linear default init: U(-1/sqrt(fan_in), 1/sqrt(fan_in))."""
    kw, kb = jax.random.split(key)
    bound = 1.0 / (in_features ** 0.5)
    w = jax.random.uniform(kw, (out_features, in_features), dtype,
                           minval=-bound, maxval=bound)
    b = jax.random.uniform(kb, (out_features,), dtype,
                           minval=-bound, maxval=bound)
    return w, b


if __name__ == "__main__":
    # Small shapes consistent with the module's forward (Linear -> ReLU -> Linear).
    batch = 8
    input_size = 32
    hidden_size = 64
    num_classes = 10

    key = jax.random.PRNGKey(0)
    k_x, k_fc1, k_fc2, k_big = jax.random.split(key, 4)

    x = jax.random.normal(k_x, (batch, input_size), dtype=jnp.float32)
    w1, b1 = init_linear_params(k_fc1, input_size, hidden_size)
    w2, b2 = init_linear_params(k_fc2, hidden_size, num_classes)

    def ref_fwd(xx):
        return jnp.maximum(xx @ w1.T + b1, 0.0) @ w2.T + b2

    # f32-weight path (single full-array tile, grid=(1,)).
    params_f32 = prepare_params(w1, b1, w2, b2, compute_dtype=jnp.float32)
    out_f32 = jax.block_until_ready(mnist_forward(x, params_f32))
    assert out_f32.shape == (batch, num_classes)
    assert jnp.allclose(out_f32, ref_fwd(x), atol=1e-4, rtol=1e-4)

    # bf16-weight path (recommended on v6e/v7x): looser tolerance vs f32 ref.
    params_bf16 = prepare_params(w1, b1, w2, b2, compute_dtype=jnp.bfloat16)
    out_bf16 = jax.block_until_ready(mnist_forward(x, params_bf16))
    assert out_bf16.shape == (batch, num_classes)
    assert jnp.allclose(out_bf16, ref_fwd(x), atol=3e-2, rtol=3e-2)

    # Larger batch: exercises the multi-step grid (batch_tile=128 -> grid=(3,)),
    # batch padding + slice, and the megacore-parallel path.
    x_big = jax.random.normal(k_big, (300, input_size), dtype=jnp.float32)
    out_big = jax.block_until_ready(mnist_forward(x_big, params_bf16, 128))
    assert out_big.shape == (300, num_classes)
    assert jnp.allclose(out_big, ref_fwd(x_big), atol=3e-2, rtol=3e-2)

    print("KERNEL_OK")
</pallas_src>

<mosaic_0001>
module attributes {stable_mosaic.version = 11 : i64} {
  func.func @mlp_kernel(%arg0: i32, %arg1: memref<8x32xf32, #tpu.memory_space<vmem>>, %arg2: memref<64x32xf32, #tpu.memory_space<vmem>>, %arg3: memref<1x64xf32, #tpu.memory_space<vmem>>, %arg4: memref<10x64xf32, #tpu.memory_space<vmem>>, %arg5: memref<1x10xf32, #tpu.memory_space<vmem>>, %arg6: memref<8x10xf32, #tpu.memory_space<vmem>>) attributes {dimension_semantics = [#tpu.dimension_semantics<parallel>], iteration_bounds = array<i64: 1>, scalar_prefetch = 0 : i64, scratch_operands = 0 : i64, tpu.core_type = #tpu.core_type<tc>, window_params = [{transform_indices = @transform_0, window_bounds = array<i64: 8, 32>}, {pipeline_mode = #tpu.pipeline_mode<synchronous>, transform_indices = @transform_1, window_bounds = array<i64: 64, 32>}, {pipeline_mode = #tpu.pipeline_mode<synchronous>, transform_indices = @transform_2, window_bounds = array<i64: 1, 64>}, {pipeline_mode = #tpu.pipeline_mode<synchronous>, transform_indices = @transform_3, window_bounds = array<i64: 10, 64>}, {pipeline_mode = #tpu.pipeline_mode<synchronous>, transform_indices = @transform_4, window_bounds = array<i64: 1, 10>}, {transform_indices = @transform_5, window_bounds = array<i64: 8, 10>}]} {
    %c0 = arith.constant 0 : index
    %c0_0 = arith.constant 0 : index
    %0 = vector.load %arg1[%c0, %c0_0] : memref<8x32xf32, #tpu.memory_space<vmem>>, vector<8x32xf32>
    %c0_1 = arith.constant 0 : index
    %c0_2 = arith.constant 0 : index
    %1 = vector.load %arg2[%c0_1, %c0_2] : memref<64x32xf32, #tpu.memory_space<vmem>>, vector<64x32xf32>
    %cst = arith.constant dense<0.000000e+00> : vector<8x64xf32>
    %2 = tpu.matmul %0, %1, %cst {dimension_numbers = #tpu.dot_dimension_numbers<[1], [1], [0], [0], [0, 0, 1, 0], [], []>} : vector<8x32xf32>, vector<64x32xf32>, vector<8x64xf32> -> vector<8x64xf32>
    %c0_3 = arith.constant 0 : index
    %c0_4 = arith.constant 0 : index
    %3 = vector.load %arg3[%c0_3, %c0_4] : memref<1x64xf32, #tpu.memory_space<vmem>>, vector<1x64xf32>
    %4 = vector.broadcast %3 : vector<1x64xf32> to vector<8x64xf32>
    %5 = arith.addf %2, %4 : vector<8x64xf32>
    %cst_5 = arith.constant 0.000000e+00 : f32
    %6 = vector.broadcast %cst_5 : f32 to vector<8x64xf32>
    %7 = arith.maximumf %5, %6 : vector<8x64xf32>
    %c0_6 = arith.constant 0 : index
    %c0_7 = arith.constant 0 : index
    %8 = vector.load %arg4[%c0_6, %c0_7] : memref<10x64xf32, #tpu.memory_space<vmem>>, vector<10x64xf32>
    %cst_8 = arith.constant dense<0.000000e+00> : vector<8x10xf32>
    %9 = tpu.matmul %7, %8, %cst_8 {dimension_numbers = #tpu.dot_dimension_numbers<[1], [1], [0], [0], [0, 0, 1, 0], [], []>} : vector<8x64xf32>, vector<10x64xf32>, vector<8x10xf32> -> vector<8x10xf32>
    %c0_9 = arith.constant 0 : index
    %c0_10 = arith.constant 0 : index
    %10 = vector.load %arg5[%c0_9, %c0_10] : memref<1x10xf32, #tpu.memory_space<vmem>>, vector<1x10xf32>
    %11 = vector.broadcast %10 : vector<1x10xf32> to vector<8x10xf32>
    %12 = arith.addf %9, %11 : vector<8x10xf32>
    %c0_11 = arith.constant 0 : index
    %c0_12 = arith.constant 0 : index
    %13 = vector.load %arg6[%c0_11, %c0_12] : memref<8x10xf32, #tpu.memory_space<vmem>>, vector<8x10xf32>
    tpu.vector_store %arg6[%c0_11, %c0_12], %12 {strides = array<i32>} : memref<8x10xf32, #tpu.memory_space<vmem>>, vector<8x10xf32>,
    return
  }
  func.func @transform_0(%arg0: i32) -> (i32, i32) {
    %c0_i32 = arith.constant 0 : i32
    %c0_i32_0 = arith.constant 0 : i32
    return %arg0, %c0_i32 : i32, i32
  }
  func.func @transform_1(%arg0: i32) -> (i32, i32) {
    %c0_i32 = arith.constant 0 : i32
    %c0_i32_0 = arith.constant 0 : i32
    %c0_i32_1 = arith.constant 0 : i32
    return %c0_i32, %c0_i32_0 : i32, i32
  }
  func.func @transform_2(%arg0: i32) -> (i32, i32) {
    %c0_i32 = arith.constant 0 : i32
    %c0_i32_0 = arith.constant 0 : i32
    %c0_i32_1 = arith.constant 0 : i32
    return %c0_i32, %c0_i32_0 : i32, i32
  }
  func.func @transform_3(%arg0: i32) -> (i32, i32) {
    %c0_i32 = arith.constant 0 : i32
    %c0_i32_0 = arith.constant 0 : i32
    %c0_i32_1 = arith.constant 0 : i32
    return %c0_i32, %c0_i32_0 : i32, i32
  }
  func.func @transform_4(%arg0: i32) -> (i32, i32) {
    %c0_i32 = arith.constant 0 : i32
    %c0_i32_0 = arith.constant 0 : i32
    %c0_i32_1 = arith.constant 0 : i32
    return %c0_i32, %c0_i32_0 : i32, i32
  }
  func.func @transform_5(%arg0: i32) -> (i32, i32) {
    %c0_i32 = arith.constant 0 : i32
    %c0_i32_0 = arith.constant 0 : i32
    return %arg0, %c0_i32 : i32, i32
  }
}

</mosaic_0001>

<bundles_post_ra>
// kernel: mnist_forward.1
= control target key start
LH: loop header
LB: loop body
LE: loop exit
PB: predicated region body
PF: predicated region fallthrough
CT: control target
= control target key end

     0   :  { %vm34_vm0 = vcmask 261120   ;;  %vm89_vm1 = vcmask 523264   ;;  %s263_s0 = inlined_call_operand.vmem [shape: f32[8,32], index: 0, kind: input, shape index: {}]   ;;  %s264_s1 = inlined_call_operand.vmem [shape: f32[64,32], index: 1, kind: input, shape index: {}]   ;;  %s265_s2 = inlined_call_operand.vmem [shape: f32[1,64], index: 2, kind: input, shape index: {}]   ;;  %s266_s3 = inlined_call_operand.vmem [shape: f32[10,64], index: 3, kind: input, shape index: {}]   ;;  %s267_s4 = inlined_call_operand.vmem [shape: f32[1,10], index: 4, kind: input, shape index: {}]   ;;  %s268_s5 = inlined_call_operand.hbm [shape: f32[8,10], index: 5, kind: output, shape index: {}]  }
   0x1   :  { %v29_v0 = vld [vmem:[%s264_s1 + $0x38] sm:$0xff]  ;;  %v28_v1 = vld [vmem:[%s264_s1 + $0x30] sm:$0xff]  ;;  %v84_v2 = vld [vmem:[%s266_s3 + $0x8] sm:$0x3] }
   0x2   :  { %137 = vmatpush.xpose.msk.msra.mxu0 %vm34_vm0, %v29_v0  ;;  %146 = vmatpush.xpose.msk.msra.mxu1 %vm89_vm1, %v84_v2 }
   0x3   :  { %10 = vsyncpa [#allocation3], 0  ;;  %v27_v3 = vld [vmem:[%s264_s1 + $0x28] sm:$0xff]  ;;  %v26_v4 = vld [vmem:[%s264_s1 + $0x20] sm:$0xff]  ;;  %vm119_vm2 = vcmask 80896  }
   0x4   :  { %v25_v5 = vld [vmem:[%s264_s1 + $0x18] sm:$0xff]  ;;  %v24_v6 = vld [vmem:[%s264_s1 + $0x10] sm:$0xff]  ;;  %v23_v7 = vld [vmem:[%s264_s1 + $0x8] sm:$0xff] }
   0x5   :  { %v22_v8 = vld [vmem:[%s264_s1] sm:$0xff] }
   0x6   :  { %138 = vmatpush.xpose.msk.msra.mxu0 %vm34_vm0, %v28_v1  ;;  %v21_v9 = vld [vmem:[%s263_s0] sm:$0xff]  ;;  %s178_s0 = smov [#allocation2]  }
   0x7   :  { %v83_v10 = vld [vmem:[%s266_s3] sm:$0xff]  ;;  %s126_s18 = sshll.u32 %s178_s0, 4  ;;  %s128_s3 = sshll.u32 %s268_s5, 4  ;;  %s127_s18 = int_to_ptr.vmem [resolvable:$true] %s126_s18  ;;  %s129_s3 = int_to_ptr.hbm [resolvable:$true] %s128_s3 }
   0x8   :  { %147 = vmatpush.xpose.msk.msra.mxu1 %vm89_vm1, %v83_v10  ;;  %v150_v11 = vld [vmem:[%s265_s2] ss:$0 sm:$0xff] }
   0x9   :  { %v151_v15 = vld [vmem:[%s267_s4] ss:$0 sm:$0xff] }
   0xa   :  { %139 = vmatpush.xpose.msk.msra.mxu0 %vm34_vm0, %v27_v3 }
   0xe   :  { %140 = vmatpush.xpose.msk.msra.mxu0 %vm34_vm0, %v26_v4 }
  0x12   :  { %141 = vmatpush.xpose.msk.msra.mxu0 %vm34_vm0, %v25_v5 }
  0x16   :  { %142 = vmatpush.xpose.msk.msra.mxu0 %vm34_vm0, %v24_v6 }
  0x1a   :  { %143 = vmatpush.xpose.msk.msra.mxu0 %vm34_vm0, %v23_v7 }
  0x1e   :  { %144 = vmatpush.xpose.msk.msra.mxu0 %vm34_vm0, %v22_v8 }
  0x21   :  { %145 = vmatmul.msk.f32.vlgmr.msra.gmra.mxu0 %vm34_vm0, %v21_v9 }
  0x9e   :  { %v79_v12 = vpop.f32.mrf.mxu0 }
  0x9f   :  { %v80_v13 = vadd.f32 %v150_v11, %v79_v12 }
  0xa1   :  { %v82_v14 = vmax.f32 %v80_v13, 0.0 }
  0xa3   :  { %148 = vmatmul.msk.f32.vlgmr.msra.gmra.mxu1 %vm89_vm1, %v82_v14 }
 0x120   :  { %v116_v16 = vpop.f32.mrf.mxu1 }
 0x121   :  { %v117_v17 = vadd.f32 %v151_v15, %v116_v16 }
 0x123   :  { %120 = vst.msk [vmem:[#allocation2] sm:$0xff] %vm119_vm2, %v117_v17 }
 0x124   :  { %131 = dma.vmem_to_hbm [thread:$0]  %s127_s18, 128, %s129_s3, [#allocation3]  }
 0x125   :  { %176 = dma.done.wait [#allocation3], 128  }
 0x126   :  { %177 = vsyncadd [#allocation3], 4294967168 }
 0x127   :  { %136 = vsyncpa [#allocation3], 1 }

</bundles_post_ra>
